<compile_context>
chip_gen: v6e
topology: v6e:2x2x1
jax: 0.10.0
libtpu: 0.0.40
codegen_flags: <defaults>
</compile_context>

<pallas_src>
import functools

import jax
import jax.numpy as jnp
from jax import lax
from jax.experimental import pallas as pl
from jax.experimental.pallas import tpu as pltpu

# "config.settings" constants, chosen small but consistent with the module.
BB_OUTPUT = 32          # config.settings['bb_output']
F_DIMS = 32             # config.settings['F_dims']
NUM_C = 4               # config.settings['num_C'][src_dataset]
NUM_CLS_HEADS = 2       # config.settings['num_cls_heads']
SS_OUT = 4              # ss task head output (4-way, e.g. rotation prediction)
HEADS_OUT = NUM_C * NUM_CLS_HEADS + SS_OUT   # 12 packed classifier + ss-head lanes
HID = BB_OUTPUT // 2                         # 16 (Fs hidden width)

OUT_LANES = 128                                       # lane-dense packed output width
PACK_G0, PACK_F0, PACK_H0 = 0, BB_OUTPUT, BB_OUTPUT + F_DIMS   # 0, 32, 64
PACK_USED = BB_OUTPUT + F_DIMS + HEADS_OUT                     # 76


# ---------------------------------------------------------------------------
# Fused kernel: (im2col patches) conv + ReLU + GAP -> Fs MLP -> C + SS heads
# ---------------------------------------------------------------------------
def _fused_kernel(patch_ref, wconv_ref, wdense_ref, bias_ref, out_ref, *,
                  HW, spatial_chunk, inv_hw):
    # patch_ref : (TB, H*W, 9*Cin)  im2col patches (conv_dtype)
    # wconv_ref : (9*Cin, Cout)     im2col conv weight, rows ordered (kh, kw, cin)
    # wdense_ref: (80, 32)  f32     rows 0:32  = w1 (32,16)
    #                               rows 32:48 = w2 (16,32)
    #                               rows 48:80 = wh (32,12)  classifier+SS merged
    # bias_ref  : (4, 32)   f32     row0 conv_b | row1 b1 | row2 b2 | row3 bh
    # out_ref   : (TB, 128) f32     lanes 0:32 g | 32:64 feat | 64:76 heads | pad
    TB = patch_ref.shape[0]
    K = patch_ref.shape[-1]
    Cout = wconv_ref.shape[-1]
    n_chunks = HW // spatial_chunk

    wconv = wconv_ref[...]
    bconv = bias_ref[0:1, 0:Cout]

    def pooled_conv(patch3d, nrows):
        # (TB, nrows, K) -> one MXU push; pooling = sublane sum (XLU), overlaps MXU.
        conv = jnp.dot(patch3d.reshape(TB * nrows, K), wconv,
                       preferred_element_type=jnp.float32)
        conv = jnp.maximum(conv + bconv, 0.0)          # bias + ReLU per spatial element
        return conv.reshape(TB, nrows, Cout).sum(axis=1)

    if n_chunks == 1:
        acc = pooled_conv(patch_ref[...], HW)
    else:
        def body(c, acc):
            s0 = pl.multiple_of(c * spatial_chunk, spatial_chunk)
            return acc + pooled_conv(
                patch_ref[:, pl.ds(s0, spatial_chunk), :], spatial_chunk)
        acc = lax.fori_loop(0, n_chunks, body,
                            jnp.zeros((TB, Cout), jnp.float32),
                            unroll=(n_chunks <= 8))

    g = acc * inv_hw                                    # global average pool

    # Fs: Linear -> ReLU -> (dropout = identity at inference) -> Linear
    # TODO(synk): training-time dropout masks in F/C omitted (identity at eval).
    w1 = wdense_ref[0:BB_OUTPUT, 0:HID]
    w2 = wdense_ref[BB_OUTPUT:BB_OUTPUT + HID, 0:F_DIMS]
    wh = wdense_ref[BB_OUTPUT + HID:BB_OUTPUT + HID + F_DIMS, 0:HEADS_OUT]
    b1 = bias_ref[1:2, 0:HID]
    b2 = bias_ref[2:3, 0:F_DIMS]
    bh = bias_ref[3:4, 0:HEADS_OUT]

    h = jnp.maximum(jnp.dot(g, w1, preferred_element_type=jnp.float32) + b1, 0.0)
    feat = jnp.dot(h, w2, preferred_element_type=jnp.float32) + b2
    heads = jnp.dot(feat, wh, preferred_element_type=jnp.float32) + bh

    # Single lane-dense (128-wide) store; split into g/feat/logits in the wrapper.
    pad = jnp.zeros((TB, OUT_LANES - PACK_USED), jnp.float32)
    out_ref[...] = jnp.concatenate([g, feat, heads, pad], axis=-1).astype(out_ref.dtype)


def _pick_spatial_chunk(HW, tb, cin, conv_bytes, budget_bytes=2 << 20):
    """Largest divisor of H*W keeping the per-chunk patch + conv temporaries small."""
    per_pos = tb * (9 * cin * conv_bytes + 2 * BB_OUTPUT * 4)
    max_pos = max(1, budget_bytes // per_pos)
    best = 1
    for d in range(1, HW + 1):
        if HW % d == 0 and d <= max_pos:
            best = d
    return best


# ---------------------------------------------------------------------------
# Params / wrapper
# ---------------------------------------------------------------------------
def init_params(key, cin):
    ks = jax.random.split(key, 10)
    s = 0.1
    conv_w_pt = s * jax.random.normal(ks[0], (BB_OUTPUT, cin, 3, 3), jnp.float32)
    conv_b = s * jax.random.normal(ks[1], (BB_OUTPUT,), jnp.float32)
    w1 = s * jax.random.normal(ks[2], (HID, BB_OUTPUT), jnp.float32)
    b1 = s * jax.random.normal(ks[3], (HID,), jnp.float32)
    w2 = s * jax.random.normal(ks[4], (F_DIMS, HID), jnp.float32)
    b2 = s * jax.random.normal(ks[5], (F_DIMS,), jnp.float32)
    wc = s * jax.random.normal(ks[6], (NUM_C * NUM_CLS_HEADS, F_DIMS), jnp.float32)
    bc = s * jax.random.normal(ks[7], (NUM_C * NUM_CLS_HEADS,), jnp.float32)
    ws = s * jax.random.normal(ks[8], (SS_OUT, F_DIMS), jnp.float32)
    bs = s * jax.random.normal(ks[9], (SS_OUT,), jnp.float32)
    return dict(conv_w=conv_w_pt, conv_b=conv_b, w1=w1, b1=b1, w2=w2, b2=b2,
                wc=wc, bc=bc, ws=ws, bs=bs)


@functools.partial(jax.jit, static_argnames=("conv_dtype", "batch_tile"))
def single_source_net_forward(x_nchw, params, *, conv_dtype=jnp.bfloat16,
                              batch_tile=None):
    """Fused forward. bf16 conv operands by default (f32 accumulate); pass
    conv_dtype=jnp.float32 for an exact-semantics path."""
    B, Cin, H, W = x_nchw.shape
    Cout = BB_OUTPUT
    HW = H * W
    K = 9 * Cin
    conv_bytes = jnp.dtype(conv_dtype).itemsize

    # im2col hoisted out of the kernel: patches (B, H*W, 9*Cin), taps ordered (kh, kw).
    x_nhwc = jnp.transpose(x_nchw, (0, 2, 3, 1))
    x_pad = jnp.pad(x_nhwc, ((0, 0), (1, 1), (1, 1), (0, 0))).astype(conv_dtype)
    taps = [x_pad[:, kh:kh + H, kw:kw + W, :] for kh in range(3) for kw in range(3)]
    patches = jnp.concatenate(taps, axis=-1).reshape(B, HW, K)

    # Batch tile: large (up to 128), multiple of 8, and >= 2 grid steps when B permits
    # so v7x megacore ("parallel" axis) can use both TensorCores.
    if batch_tile is not None:
        tb = batch_tile
    elif B <= 8:
        tb = B
    else:
        tb = min(128, max(8, ((-(-B // 2) + 7) // 8) * 8))
    if tb < B and tb % 8:
        tb = ((tb + 7) // 8) * 8
    Bp = ((B + tb - 1) // tb) * tb
    if Bp != B:
        # NOTE: padded rows yield garbage outputs (bias propagated through ReLU/MLP);
        # only valid because we slice [:B] below.
        patches = jnp.pad(patches, ((0, Bp - B), (0, 0), (0, 0)))

    # Conv weight (Cout, Cin, 3, 3) -> im2col operand (9*Cin, Cout), rows (kh, kw, cin).
    wconv = jnp.transpose(params["conv_w"], (2, 3, 1, 0)).reshape(K, Cout)
    wconv = wconv.astype(conv_dtype)

    # Dense weights packed into one f32 block (row offsets are multiples of 8).
    rows = BB_OUTPUT + HID + F_DIMS
    cols = max(HID, F_DIMS, HEADS_OUT)
    wdense = jnp.zeros((rows, cols), jnp.float32)
    wdense = wdense.at[0:BB_OUTPUT, 0:HID].set(params["w1"].T)
    wdense = wdense.at[BB_OUTPUT:BB_OUTPUT + HID, 0:F_DIMS].set(params["w2"].T)
    wh = jnp.concatenate([params["wc"].T, params["ws"].T], axis=1)     # (F_DIMS, 12)
    wdense = wdense.at[BB_OUTPUT + HID:rows, 0:HEADS_OUT].set(wh)

    # All biases packed into one (4, 32) f32 block.
    bias = jnp.zeros((4, max(Cout, cols)), jnp.float32)
    bias = bias.at[0, 0:Cout].set(params["conv_b"])
    bias = bias.at[1, 0:HID].set(params["b1"])
    bias = bias.at[2, 0:F_DIMS].set(params["b2"])
    bias = bias.at[3, 0:HEADS_OUT].set(jnp.concatenate([params["bc"], params["bs"]]))

    spatial_chunk = _pick_spatial_chunk(HW, tb, Cin, conv_bytes)
    kernel = functools.partial(_fused_kernel, HW=HW, spatial_chunk=spatial_chunk,
                               inv_hw=1.0 / HW)

    # Footprint-derived VMEM limit (input tile x2 buffers + weights + chunk temporaries
    # + output x2), with 2x safety margin, floored at 8 MiB and capped at 32 MiB so it
    # stays well inside v7x's 64 MiB physical VMEM.
    patch_tile_b = tb * HW * K * conv_bytes
    out_tile_b = tb * OUT_LANES * 4
    weight_b = wconv.size * conv_bytes + (wdense.size + bias.size) * 4
    chunk_tmp_b = tb * spatial_chunk * (K * conv_bytes + 2 * Cout * 4)
    footprint = 2 * (patch_tile_b + out_tile_b + weight_b) + chunk_tmp_b + tb * Cout * 4
    vmem_limit = int(min(max(2 * footprint, 8 * 2**20), 32 * 2**20))

    def full(arr):
        zeros = (0,) * arr.ndim
        return pl.BlockSpec(arr.shape, lambda b, _z=zeros: _z)

    packed = pl.pallas_call(
        kernel,
        out_shape=jax.ShapeDtypeStruct((Bp, OUT_LANES), jnp.float32),
        grid=(Bp // tb,),
        in_specs=[
            pl.BlockSpec((tb, HW, K), lambda b: (b, 0, 0)),
            full(wconv), full(wdense), full(bias),
        ],
        out_specs=pl.BlockSpec((tb, OUT_LANES), lambda b: (b, 0)),
        compiler_params=pltpu.CompilerParams(
            # batch axis is independent -> megacore-parallel on v7x; no-op on v5e/v6e
            dimension_semantics=("parallel",),
            vmem_limit_bytes=vmem_limit,
        ),
    )(patches, wconv, wdense, bias)

    packed = packed[:B]
    g = packed[:, PACK_G0:PACK_G0 + BB_OUTPUT]
    feat = packed[:, PACK_F0:PACK_F0 + F_DIMS]
    logits_c = packed[:, PACK_H0:PACK_H0 + NUM_C * NUM_CLS_HEADS]
    logits_ss = packed[:, PACK_H0 + NUM_C * NUM_CLS_HEADS:PACK_USED]
    return g, feat, logits_c, logits_ss


def _reference_forward(x_nchw, params):
    """Pure-JAX reference with identical semantics (correctness check)."""
    B, Cin, H, W = x_nchw.shape
    x_nhwc = jnp.transpose(x_nchw, (0, 2, 3, 1))
    x_pad = jnp.pad(x_nhwc, ((0, 0), (1, 1), (1, 1), (0, 0)))
    conv_w = jnp.transpose(params["conv_w"], (2, 3, 1, 0)).reshape(9, Cin, BB_OUTPUT)
    acc = jnp.zeros((B, H, W, BB_OUTPUT), jnp.float32)
    tap = 0
    for kh in range(3):
        for kw in range(3):
            acc = acc + jnp.einsum("bhwc,cd->bhwd",
                                   x_pad[:, kh:kh + H, kw:kw + W, :], conv_w[tap])
            tap += 1
    acc = jnp.maximum(acc + params["conv_b"][None, None, None, :], 0.0)
    g = jnp.mean(acc, axis=(1, 2))
    h = jnp.maximum(g @ params["w1"].T + params["b1"], 0.0)
    feat = h @ params["w2"].T + params["b2"]
    logits_c = feat @ params["wc"].T + params["bc"]
    logits_ss = feat @ params["ws"].T + params["bs"]
    return g, feat, logits_c, logits_ss


if __name__ == "__main__":
    key = jax.random.PRNGKey(0)
    kx, kp = jax.random.split(key)
    B, Cin, H, W = 2, 4, 16, 16
    x = jax.random.normal(kx, (B, Cin, H, W), jnp.float32)   # NCHW, like PyTorch
    params = init_params(kp, Cin)

    refs = _reference_forward(x, params)

    # f32 operands: exact-semantics check.
    outs = jax.block_until_ready(
        single_source_net_forward(x, params, conv_dtype=jnp.float32))
    for o, r in zip(outs, refs):
        assert o.shape == r.shape, (o.shape, r.shape)
        assert jnp.allclose(o, r, rtol=1e-4, atol=1e-4), "f32 mismatch vs reference"

    # Default bf16 conv operands (HBM-bandwidth path); f32 accumulate -> loose check.
    outs_bf16 = jax.block_until_ready(single_source_net_forward(x, params))
    for o, r in zip(outs_bf16, refs):
        assert jnp.allclose(o, r, rtol=5e-2, atol=7.5e-2), "bf16 mismatch vs reference"

    print("KERNEL_OK")
</pallas_src>

<mosaic_0001>
module attributes {stable_mosaic.version = 11 : i64} {
  func.func @_fused_kernel(%arg0: i32, %arg1: memref<2x256x36xf32, #tpu.memory_space<vmem>>, %arg2: memref<36x32xf32, #tpu.memory_space<vmem>>, %arg3: memref<80x32xf32, #tpu.memory_space<vmem>>, %arg4: memref<4x32xf32, #tpu.memory_space<vmem>>, %arg5: memref<2x128xf32, #tpu.memory_space<vmem>>) attributes {dimension_semantics = [#tpu.dimension_semantics<parallel>], iteration_bounds = array<i64: 1>, scalar_prefetch = 0 : i64, scratch_operands = 0 : i64, tpu.core_type = #tpu.core_type<tc>, window_params = [{transform_indices = @transform_0, window_bounds = array<i64: 2, 256, 36>}, {pipeline_mode = #tpu.pipeline_mode<synchronous>, transform_indices = @transform_1, window_bounds = array<i64: 36, 32>}, {pipeline_mode = #tpu.pipeline_mode<synchronous>, transform_indices = @transform_2, window_bounds = array<i64: 80, 32>}, {pipeline_mode = #tpu.pipeline_mode<synchronous>, transform_indices = @transform_3, window_bounds = array<i64: 4, 32>}, {transform_indices = @transform_4, window_bounds = array<i64: 2, 128>}]} {
    %c0 = arith.constant 0 : index
    %c0_0 = arith.constant 0 : index
    %0 = vector.load %arg2[%c0, %c0_0] : memref<36x32xf32, #tpu.memory_space<vmem>>, vector<36x32xf32>
    %c0_1 = arith.constant 0 : index
    %c0_2 = arith.constant 0 : index
    %1 = vector.load %arg4[%c0_1, %c0_2] : memref<4x32xf32, #tpu.memory_space<vmem>>, vector<1x32xf32>
    %c0_3 = arith.constant 0 : index
    %c0_4 = arith.constant 0 : index
    %c0_5 = arith.constant 0 : index
    %2 = vector.load %arg1[%c0_3, %c0_4, %c0_5] : memref<2x256x36xf32, #tpu.memory_space<vmem>>, vector<2x256x36xf32>
    %3 = vector.shape_cast %2 : vector<2x256x36xf32> to vector<512x36xf32>
    %cst = arith.constant dense<0.000000e+00> : vector<512x32xf32>
    %4 = tpu.matmul %3, %0, %cst {dimension_numbers = #tpu.dot_dimension_numbers<[1], [0], [0], [1], [0, 0, 1, 1], [], []>} : vector<512x36xf32>, vector<36x32xf32>, vector<512x32xf32> -> vector<512x32xf32>
    %5 = vector.broadcast %1 : vector<1x32xf32> to vector<512x32xf32>
    %6 = arith.addf %4, %5 : vector<512x32xf32>
    %cst_6 = arith.constant 0.000000e+00 : f32
    %7 = vector.broadcast %cst_6 : f32 to vector<512x32xf32>
    %8 = arith.maximumf %6, %7 : vector<512x32xf32>
    %9 = vector.shape_cast %8 : vector<512x32xf32> to vector<2x256x32xf32>
    %cst_7 = arith.constant dense<0.000000e+00> : vector<2x32xf32>
    %10 = vector.multi_reduction <add>, %9, %cst_7 [1] : vector<2x256x32xf32> to vector<2x32xf32>
    %cst_8 = arith.constant 3.906250e-03 : f32
    %11 = vector.broadcast %cst_8 : f32 to vector<2x32xf32>
    %12 = arith.mulf %10, %11 : vector<2x32xf32>
    %c0_9 = arith.constant 0 : index
    %c0_10 = arith.constant 0 : index
    %13 = vector.load %arg3[%c0_9, %c0_10] : memref<80x32xf32, #tpu.memory_space<vmem>>, vector<32x16xf32>
    %c32 = arith.constant 32 : index
    %c0_11 = arith.constant 0 : index
    %14 = vector.load %arg3[%c32, %c0_11] : memref<80x32xf32, #tpu.memory_space<vmem>>, vector<16x32xf32>
    %c48 = arith.constant 48 : index
    %c0_12 = arith.constant 0 : index
    %15 = vector.load %arg3[%c48, %c0_12] : memref<80x32xf32, #tpu.memory_space<vmem>>, vector<32x12xf32>
    %c1 = arith.constant 1 : index
    %c0_13 = arith.constant 0 : index
    %16 = vector.load %arg4[%c1, %c0_13] : memref<4x32xf32, #tpu.memory_space<vmem>>, vector<1x16xf32>
    %c2 = arith.constant 2 : index
    %c0_14 = arith.constant 0 : index
    %17 = vector.load %arg4[%c2, %c0_14] : memref<4x32xf32, #tpu.memory_space<vmem>>, vector<1x32xf32>
    %c3 = arith.constant 3 : index
    %c0_15 = arith.constant 0 : index
    %18 = vector.load %arg4[%c3, %c0_15] : memref<4x32xf32, #tpu.memory_space<vmem>>, vector<1x12xf32>
    %cst_16 = arith.constant dense<0.000000e+00> : vector<2x16xf32>
    %19 = tpu.matmul %12, %13, %cst_16 {dimension_numbers = #tpu.dot_dimension_numbers<[1], [0], [0], [1], [0, 0, 1, 1], [], []>} : vector<2x32xf32>, vector<32x16xf32>, vector<2x16xf32> -> vector<2x16xf32>
    %20 = vector.broadcast %16 : vector<1x16xf32> to vector<2x16xf32>
    %21 = arith.addf %19, %20 : vector<2x16xf32>
    %cst_17 = arith.constant 0.000000e+00 : f32
    %22 = vector.broadcast %cst_17 : f32 to vector<2x16xf32>
    %23 = arith.maximumf %21, %22 : vector<2x16xf32>
    %cst_18 = arith.constant dense<0.000000e+00> : vector<2x32xf32>
    %24 = tpu.matmul %23, %14, %cst_18 {dimension_numbers = #tpu.dot_dimension_numbers<[1], [0], [0], [1], [0, 0, 1, 1], [], []>} : vector<2x16xf32>, vector<16x32xf32>, vector<2x32xf32> -> vector<2x32xf32>
    %25 = vector.broadcast %17 : vector<1x32xf32> to vector<2x32xf32>
    %26 = arith.addf %24, %25 : vector<2x32xf32>
    %cst_19 = arith.constant dense<0.000000e+00> : vector<2x12xf32>
    %27 = tpu.matmul %26, %15, %cst_19 {dimension_numbers = #tpu.dot_dimension_numbers<[1], [0], [0], [1], [0, 0, 1, 1], [], []>} : vector<2x32xf32>, vector<32x12xf32>, vector<2x12xf32> -> vector<2x12xf32>
    %28 = vector.broadcast %18 : vector<1x12xf32> to vector<2x12xf32>
    %29 = arith.addf %27, %28 : vector<2x12xf32>
    %cst_20 = arith.constant 0.000000e+00 : f32
    %30 = vector.broadcast %cst_20 : f32 to vector<2x52xf32>
    %31 = tpu.concatenate %12, %26, %29, %30 in 1 : vector<2x32xf32>, vector<2x32xf32>, vector<2x12xf32>, vector<2x52xf32> -> vector<2x128xf32>
    %c0_21 = arith.constant 0 : index
    %c0_22 = arith.constant 0 : index
    %32 = vector.load %arg5[%c0_21, %c0_22] : memref<2x128xf32, #tpu.memory_space<vmem>>, vector<2x128xf32>
    tpu.vector_store %arg5[%c0_21, %c0_22], %31 {strides = array<i32>} : memref<2x128xf32, #tpu.memory_space<vmem>>, vector<2x128xf32>,
    return
  }
  func.func @transform_0(%arg0: i32) -> (i32, i32, i32) {
    %c0_i32 = arith.constant 0 : i32
    %c0_i32_0 = arith.constant 0 : i32
    %c0_i32_1 = arith.constant 0 : i32
    return %arg0, %c0_i32, %c0_i32_0 : i32, i32, i32
  }
  func.func @transform_1(%arg0: i32) -> (i32, i32) {
    %c0_i32 = arith.constant 0 : i32
    %c0_i32_0 = arith.constant 0 : i32
    %c0_i32_1 = arith.constant 0 : i32
    return %c0_i32, %c0_i32_0 : i32, i32
  }
  func.func @transform_2(%arg0: i32) -> (i32, i32) {
    %c0_i32 = arith.constant 0 : i32
    %c0_i32_0 = arith.constant 0 : i32
    %c0_i32_1 = arith.constant 0 : i32
    return %c0_i32, %c0_i32_0 : i32, i32
  }
  func.func @transform_3(%arg0: i32) -> (i32, i32) {
    %c0_i32 = arith.constant 0 : i32
    %c0_i32_0 = arith.constant 0 : i32
    %c0_i32_1 = arith.constant 0 : i32
    return %c0_i32, %c0_i32_0 : i32, i32
  }
  func.func @transform_4(%arg0: i32) -> (i32, i32) {
    %c0_i32 = arith.constant 0 : i32
    %c0_i32_0 = arith.constant 0 : i32
    return %arg0, %c0_i32 : i32, i32
  }
}

</mosaic_0001>

<bundles_post_ra>
// kernel: single_source_net_forward.1
= control target key start
LH: loop header
LB: loop body
LE: loop exit
PB: predicated region body
PF: predicated region fallthrough
CT: control target
= control target key end

     0   :  { %vm284_vm0 = vcmask 1043456   ;;  %vm91_vm1 = vcmask 293888   ;;  %vm737_vm2 = vcmask 261120   ;;  %vm1449_vm3 = vmmov 0   ;;  %s1450_s16 = smov 32   ;;  %s1994_s1 = inlined_call_operand.vmem [shape: f32[36,32], index: 1, kind: input, shape index: {}]   ;;  %s1995_s0 = inlined_call_operand.vmem [shape: f32[2,256,36], index: 0, kind: input, shape index: {}]   ;;  %s1996_s2 = inlined_call_operand.vmem [shape: f32[80,32], index: 2, kind: input, shape index: {}]   ;;  %s1997_s3 = inlined_call_operand.vmem [shape: f32[4,32], index: 3, kind: input, shape index: {}]   ;;  %s1998_s4 = inlined_call_operand.vmem [shape: f32[2,128], index: 4, kind: output, shape index: {}]  }
   0x1   :  { %v21_v0 = vld [vmem:[%s1994_s1 + $0x20] sm:$0xf]  ;;  %v20_v1 = vld [vmem:[%s1994_s1 + $0x18] sm:$0xff]  ;;  %v19_v3 = vld [vmem:[%s1994_s1 + $0x10] sm:$0xff]  ;;  %vm897_vm4 = vcmask 1041409   ;;  %vm976_vm5 = vcmask 130048  }
   0x2   :  { %1299 = vmatprep.subr.msk.mxu0 %vm284_vm0, %v21_v0  ;;  %v23_v2 = vld [vmem:[%s1995_s0] sm:$0xff]  ;;  %1434 = vmatprep.subr.msk.mxu1 %vm284_vm0, %v21_v0  ;;  %v18_v4 = vld [vmem:[%s1994_s1 + $0x8] sm:$0xff]  ;;  %v25_v7 = vld [vmem:[%s1995_s0 + $0x10] sm:$0xff]  ;;  %vm1136_vm6 = vcmask 523264   ;;  %vm1138_vm7 = vcmask 621568  }
   0x3   :  { %1300 = vmatpush3.msk.msra.mxu0 %vm284_vm0, %v21_v0  ;;  %1309 = vmatprep.mubr.msk.f32.mxu0 %vm91_vm1, %v23_v2  ;;  %v17_v5 = vld [vmem:[%s1994_s1] sm:$0xff]  ;;  %v24_v6 = vld [vmem:[%s1995_s0 + $0x8] sm:$0xff]  ;;  %v26_v8 = vld [vmem:[%s1995_s0 + $0x18] sm:$0xff] }
   0x4   :  { %1301 = vmatprep.subr.mxu0 %v20_v1  ;;  %1439 = vmatpush3.msk.msra.mxu1 %vm284_vm0, %v21_v0  ;;  %v27_v9 = vld [vmem:[%s1995_s0 + $0x20] sm:$0xff]  ;;  %v60_v11 = vld [vmem:[%s1995_s0 + $0x128] sm:$0xff]  ;;  %v61_v12 = vld [vmem:[%s1995_s0 + $0x130] sm:$0xff] }
   0x5   :  { %1302 = vmatpush3.msra.mxu0 %v20_v1  ;;  %1435 = vmatprep.subr.mxu1 %v20_v1  ;;  %v59_v10 = vld [vmem:[%s1995_s0 + $0x120] sm:$0xff]  ;;  %v28_v13 = vld [vmem:[%s1995_s0 + $0x28] sm:$0xff]  ;;  %v62_v14 = vld [vmem:[%s1995_s0 + $0x138] sm:$0xff] }
   0x6   :  { %1303 = vmatprep.subr.mxu0 %v19_v3  ;;  %1440 = vmatpush3.msra.mxu1 %v20_v1  ;;  %v29_v15 = vld [vmem:[%s1995_s0 + $0x30] sm:$0xff]  ;;  %v63_v16 = vld [vmem:[%s1995_s0 + $0x140] sm:$0xff]  ;;  %v30_v17 = vld [vmem:[%s1995_s0 + $0x38] sm:$0xff] }
   0x7   :  { %1304 = vmatpush3.msra.mxu0 %v19_v3  ;;  %1436 = vmatprep.subr.mxu1 %v19_v3  ;;  %v64_v18 = vld [vmem:[%s1995_s0 + $0x148] sm:$0xff]  ;;  %v31_v19 = vld [vmem:[%s1995_s0 + $0x40] sm:$0xff]  ;;  %v65_v20 = vld [vmem:[%s1995_s0 + $0x150] sm:$0xff] }
   0x8   :  { %1305 = vmatprep.subr.mxu0 %v18_v4  ;;  %1441 = vmatpush3.msra.mxu1 %v19_v3  ;;  %v32_v21 = vld [vmem:[%s1995_s0 + $0x48] sm:$0xff]  ;;  %v66_v22 = vld [vmem:[%s1995_s0 + $0x158] sm:$0xff]  ;;  %v33_v23 = vld [vmem:[%s1995_s0 + $0x50] sm:$0xff] }
   0x9   :  { %1306 = vmatpush3.msra.mxu0 %v18_v4  ;;  %1437 = vmatprep.subr.mxu1 %v18_v4  ;;  %v67_v24 = vld [vmem:[%s1995_s0 + $0x160] sm:$0xff]  ;;  %v34_v25 = vld [vmem:[%s1995_s0 + $0x58] sm:$0xff]  ;;  %v68_v26 = vld [vmem:[%s1995_s0 + $0x168] sm:$0xff] }
   0xa   :  { %1307 = vmatprep.subr.mxu0 %v17_v5  ;;  %1442 = vmatpush3.msra.mxu1 %v18_v4  ;;  %v35_v27 = vld [vmem:[%s1995_s0 + $0x60] sm:$0xff]  ;;  %v69_v28 = vld [vmem:[%s1995_s0 + $0x170] sm:$0xff]  ;;  %v36_v29 = vld [vmem:[%s1995_s0 + $0x68] sm:$0xff] }
   0xb   :  { %1308 = vmatpush3.msra.mxu0 %v17_v5  ;;  %1438 = vmatprep.subr.mxu1 %v17_v5  ;;  %v70_v30 = vld [vmem:[%s1995_s0 + $0x178] sm:$0xff]  ;;  %v37_v31 = vld [vmem:[%s1995_s0 + $0x70] sm:$0xff]  ;;  %v71_v32 = vld [vmem:[%s1995_s0 + $0x180] sm:$0xff] }
   0xc   :  { %1310 = vmatmul.mubr.msk.f32.vlgmr.msra.gmra.mxu0 %vm91_vm1, %v24_v6  ;;  %1443 = vmatpush3.msra.mxu1 %v17_v5  ;;  %v38_v33 = vld [vmem:[%s1995_s0 + $0x78] sm:$0xff]  ;;  %v72_v34 = vld [vmem:[%s1995_s0 + $0x188] sm:$0xff]  ;;  %v39_v35 = vld [vmem:[%s1995_s0 + $0x80] sm:$0xff]  ;;  %v1448_v5 = vmov 0.0  }
   0xd   :  { %1312 = vmatprep.mubr.msk.f32.mxu0 %vm91_vm1, %v25_v7  ;;  %1363 = vmatprep.mubr.msk.f32.mxu1 %vm91_vm1, %v59_v10  ;;  %v73_v36 = vld [vmem:[%s1995_s0 + $0x190] sm:$0xff]  ;;  %v40_v37 = vld [vmem:[%s1995_s0 + $0x88] sm:$0xff]  ;;  %v74_v38 = vld [vmem:[%s1995_s0 + $0x198] sm:$0xff] }
   0xe   :  { %1364 = vmatmul.mubr.msk.f32.vlgmr.msra.gmra.mxu1 %vm91_vm1, %v60_v11  ;;  %v41_v39 = vld [vmem:[%s1995_s0 + $0x90] sm:$0xff]  ;;  %v75_v40 = vld [vmem:[%s1995_s0 + $0x1a0] sm:$0xff]  ;;  %v42_v41 = vld [vmem:[%s1995_s0 + $0x98] sm:$0xff]  ;;  %1405 = vmatprep.subr.mxu1 %v1448_v5 }
   0xf   :  { %1366 = vmatprep.mubr.msk.f32.mxu1 %vm91_vm1, %v61_v12  ;;  %v76_v42 = vld [vmem:[%s1995_s0 + $0x1a8] sm:$0xff]  ;;  %v43_v43 = vld [vmem:[%s1995_s0 + $0xa0] sm:$0xff]  ;;  %v77_v44 = vld [vmem:[%s1995_s0 + $0x1b0] sm:$0xff] }
  0x10   :  { %1313 = vmatmul.mubr.msk.f32.gmra.mxu0 %vm91_vm1, %v26_v8  ;;  %v44_v45 = vld [vmem:[%s1995_s0 + $0xa8] sm:$0xff]  ;;  %v78_v46 = vld [vmem:[%s1995_s0 + $0x1b8] sm:$0xff]  ;;  %v45_v47 = vld [vmem:[%s1995_s0 + $0xb0] sm:$0xff] }
  0x11   :  { %1315 = vmatprep.mubr.msk.f32.mxu0 %vm91_vm1, %v27_v9  ;;  %v79_v48 = vld [vmem:[%s1995_s0 + $0x1c0] sm:$0xff]  ;;  %v46_v49 = vld [vmem:[%s1995_s0 + $0xb8] sm:$0xff]  ;;  %v80_v50 = vld [vmem:[%s1995_s0 + $0x1c8] sm:$0xff] }
  0x12   :  { %1367 = vmatmul.mubr.msk.f32.gmra.mxu1 %vm91_vm1, %v62_v14  ;;  %v47_v51 = vld [vmem:[%s1995_s0 + $0xc0] sm:$0xff]  ;;  %v81_v52 = vld [vmem:[%s1995_s0 + $0x1d0] sm:$0xff]  ;;  %v48_v53 = vld [vmem:[%s1995_s0 + $0xc8] sm:$0xff] }
  0x13   :  { %1369 = vmatprep.mubr.msk.f32.mxu1 %vm91_vm1, %v63_v16  ;;  %v82_v54 = vld [vmem:[%s1995_s0 + $0x1d8] sm:$0xff]  ;;  %v49_v55 = vld [vmem:[%s1995_s0 + $0xd0] sm:$0xff]  ;;  %v83_v56 = vld [vmem:[%s1995_s0 + $0x1e0] sm:$0xff] }
  0x14   :  { %1316 = vmatmul.mubr.msk.f32.gmra.mxu0 %vm91_vm1, %v28_v13  ;;  %v50_v57 = vld [vmem:[%s1995_s0 + $0xd8] sm:$0xff]  ;;  %v84_v58 = vld [vmem:[%s1995_s0 + $0x1e8] sm:$0xff]  ;;  %v51_v59 = vld [vmem:[%s1995_s0 + $0xe0] sm:$0xff] }
  0x15   :  { %1318 = vmatprep.mubr.msk.f32.mxu0 %vm91_vm1, %v29_v15  ;;  %v85_v60 = vld [vmem:[%s1995_s0 + $0x1f0] sm:$0xff]  ;;  %v52_v61 = vld [vmem:[%s1995_s0 + $0xe8] sm:$0xff]  ;;  %v86_v62 = vld [vmem:[%s1995_s0 + $0x1f8] sm:$0xff] }
  0x16   :  { %1370 = vmatmul.mubr.msk.f32.gmra.mxu1 %vm91_vm1, %v64_v18  ;;  %v53_v63 = vld [vmem:[%s1995_s0 + $0xf0] sm:$0xff]  ;;  %v54_v0 = vld [vmem:[%s1995_s0 + $0xf8] sm:$0xff]  ;;  %v55_v1 = vld [vmem:[%s1995_s0 + $0x100] sm:$0xff] }
  0x17   :  { %1372 = vmatprep.mubr.msk.f32.mxu1 %vm91_vm1, %v65_v20  ;;  %v56_v2 = vld [vmem:[%s1995_s0 + $0x108] sm:$0xff]  ;;  %v57_v3 = vld [vmem:[%s1995_s0 + $0x110] sm:$0xff]  ;;  %v58_v4 = vld [vmem:[%s1995_s0 + $0x118] sm:$0xff] }
  0x18   :  { %1319 = vmatmul.mubr.msk.f32.gmra.mxu0 %vm91_vm1, %v30_v17  ;;  %v881_v6 = vld [vmem:[%s1996_s2 + $0x18] sm:$0xff]  ;;  %v880_v7 = vld [vmem:[%s1996_s2 + $0x10] sm:$0xff]  ;;  %v1760_v8 = vld [vmem:[%s1997_s3] ss:$0 sm:$0xff] }
  0x19   :  { %1321 = vmatprep.mubr.msk.f32.mxu0 %vm91_vm1, %v31_v19  ;;  %1406 = vmatpush3.msra.mxu1 %v881_v6  ;;  %v879_v10 = vld [vmem:[%s1996_s2 + $0x8] sm:$0xff] }
  0x1a   :  { %1373 = vmatmul.mubr.msk.f32.gmra.mxu1 %vm91_vm1, %v66_v22  ;;  %1407 = vmatprep.subr.mxu1 %v1448_v5 }
  0x1b   :  { %1375 = vmatprep.mubr.msk.f32.mxu1 %vm91_vm1, %v67_v24  ;;  %1408 = vmatpush3.msra.mxu1 %v880_v7 }
  0x1c   :  { %1322 = vmatmul.mubr.msk.f32.gmra.mxu0 %vm91_vm1, %v32_v21  ;;  %1409 = vmatprep.subr.mxu1 %v1448_v5 }
  0x1d   :  { %1324 = vmatprep.mubr.msk.f32.mxu0 %vm91_vm1, %v33_v23  ;;  %1410 = vmatpush3.msra.mxu1 %v879_v10 }
  0x1e   :  { %1376 = vmatmul.mubr.msk.f32.gmra.mxu1 %vm91_vm1, %v68_v26  ;;  %1411 = vmatprep.subr.mxu1 %v1448_v5 }
  0x1f   :  { %1378 = vmatprep.mubr.msk.f32.mxu1 %vm91_vm1, %v69_v28 }
  0x20   :  { %1325 = vmatmul.mubr.msk.f32.gmra.mxu0 %vm91_vm1, %v34_v25 }
  0x21   :  { %1327 = vmatprep.mubr.msk.f32.mxu0 %vm91_vm1, %v35_v27 }
  0x22   :  { %1379 = vmatmul.mubr.msk.f32.gmra.mxu1 %vm91_vm1, %v70_v30 }
  0x23   :  { %1381 = vmatprep.mubr.msk.f32.mxu1 %vm91_vm1, %v71_v32 }
  0x24   :  { %1328 = vmatmul.mubr.msk.f32.gmra.mxu0 %vm91_vm1, %v36_v29 }
  0x25   :  { %1330 = vmatprep.mubr.msk.f32.mxu0 %vm91_vm1, %v37_v31 }
  0x26   :  { %1382 = vmatmul.mubr.msk.f32.gmra.mxu1 %vm91_vm1, %v72_v34 }
  0x27   :  { %1384 = vmatprep.mubr.msk.f32.mxu1 %vm91_vm1, %v73_v36 }
  0x28   :  { %1331 = vmatmul.mubr.msk.f32.gmra.mxu0 %vm91_vm1, %v38_v33 }
  0x29   :  { %1333 = vmatprep.mubr.msk.f32.mxu0 %vm91_vm1, %v39_v35 }
  0x2a   :  { %1385 = vmatmul.mubr.msk.f32.gmra.mxu1 %vm91_vm1, %v74_v38 }
  0x2b   :  { %1387 = vmatprep.mubr.msk.f32.mxu1 %vm91_vm1, %v75_v40 }
  0x2c   :  { %1334 = vmatmul.mubr.msk.f32.gmra.mxu0 %vm91_vm1, %v40_v37 }
  0x2d   :  { %1336 = vmatprep.mubr.msk.f32.mxu0 %vm91_vm1, %v41_v39 }
  0x2e   :  { %1388 = vmatmul.mubr.msk.f32.gmra.mxu1 %vm91_vm1, %v76_v42 }
  0x2f   :  { %1390 = vmatprep.mubr.msk.f32.mxu1 %vm91_vm1, %v77_v44 }
  0x30   :  { %1337 = vmatmul.mubr.msk.f32.gmra.mxu0 %vm91_vm1, %v42_v41 }
  0x31   :  { %1339 = vmatprep.mubr.msk.f32.mxu0 %vm91_vm1, %v43_v43 }
  0x32   :  { %1391 = vmatmul.mubr.msk.f32.gmra.mxu1 %vm91_vm1, %v78_v46 }
  0x33   :  { %1393 = vmatprep.mubr.msk.f32.mxu1 %vm91_vm1, %v79_v48 }
  0x34   :  { %1340 = vmatmul.mubr.msk.f32.gmra.mxu0 %vm91_vm1, %v44_v45 }
  0x35   :  { %1342 = vmatprep.mubr.msk.f32.mxu0 %vm91_vm1, %v45_v47 }
  0x36   :  { %1394 = vmatmul.mubr.msk.f32.gmra.mxu1 %vm91_vm1, %v80_v50 }
  0x37   :  { %1396 = vmatprep.mubr.msk.f32.mxu1 %vm91_vm1, %v81_v52 }
  0x38   :  { %1343 = vmatmul.mubr.msk.f32.gmra.mxu0 %vm91_vm1, %v46_v49 }
  0x39   :  { %1345 = vmatprep.mubr.msk.f32.mxu0 %vm91_vm1, %v47_v51 }
  0x3a   :  { %1397 = vmatmul.mubr.msk.f32.gmra.mxu1 %vm91_vm1, %v82_v54 }
  0x3b   :  { %1399 = vmatprep.mubr.msk.f32.mxu1 %vm91_vm1, %v83_v56 }
  0x3c   :  { %1346 = vmatmul.mubr.msk.f32.gmra.mxu0 %vm91_vm1, %v48_v53 }
  0x3d   :  { %1348 = vmatprep.mubr.msk.f32.mxu0 %vm91_vm1, %v49_v55  ;;  %v878_v55 = vld [vmem:[%s1996_s2] sm:$0xff] }
  0x3e   :  { %1400 = vmatmul.mubr.msk.f32.gmra.mxu1 %vm91_vm1, %v84_v58 }
  0x3f   :  { %1402 = vmatprep.mubr.msk.f32.mxu1 %vm91_vm1, %v85_v60  ;;  %1412 = vmatpush3.msra.mxu1 %v878_v55 }
  0x40   :  { %1349 = vmatmul.mubr.msk.f32.gmra.mxu0 %vm91_vm1, %v50_v57  ;;  %1416 = vmatprep.subr.mxu1 %v1448_v5 }
  0x41   :  { %1351 = vmatprep.mubr.msk.f32.mxu0 %vm91_vm1, %v51_v59 }
  0x42   :  { %1403 = vmatmul.mubr.msk.f32.gmra.mxu1 %vm91_vm1, %v86_v62 }
  0x43   :  { %1413 = vmatprep.mubr.msk.f32.mxu1 %vm1449_vm3, %v1448_v5 }
  0x44   :  { %1352 = vmatmul.mubr.msk.f32.gmra.mxu0 %vm91_vm1, %v52_v61 }
  0x45   :  { %1354 = vmatprep.mubr.msk.f32.mxu0 %vm91_vm1, %v53_v63 }
  0x48   :  { %1355 = vmatmul.mubr.msk.f32.gmra.mxu0 %vm91_vm1, %v54_v0 }
  0x49   :  { %1357 = vmatprep.mubr.msk.f32.mxu0 %vm91_vm1, %v55_v1 }
  0x4c   :  { %1358 = vmatmul.mubr.msk.f32.gmra.mxu0 %vm91_vm1, %v56_v2 }
  0x4d   :  { %1360 = vmatprep.mubr.msk.f32.mxu0 %vm91_vm1, %v57_v3 }
  0x50   :  { %1361 = vmatmul.mubr.msk.f32.gmra.mxu0 %vm91_vm1, %v58_v4 }
  0xcc   :  { %v1311_v9 = vpop.f32.mrf.mxu0 }
  0xcd   :  { %v360_v11 = vadd.f32 %v1311_v9, %v1760_v8 }
  0xce   :  { %v354_v12 = vpop.f32.mrf.mxu0  ;;  %v1775_v32 = vpop.f32.mrf.mxu1 }
  0xcf   :  { %v674_v13 = vmax.f32 %v360_v11, 0.0  ;;  %v355_v14 = vadd.f32 %v1760_v8, %v354_v12 }
  0xd0   :  { %v1314_v15 = vpop.f32.mrf.mxu0  ;;  %v1781_v43 = vpop.f32.mrf.mxu1 }
  0xd1   :  { %v673_v16 = vmax.f32 %v355_v14, 0.0  ;;  %v370_v17 = vadd.f32 %v1314_v15, %v1760_v8  ;;  %v739_v19 = vsel %vm737_vm2, %v674_v13, 0.0 }
  0xd2   :  { %v364_v18 = vpop.f32.mrf.mxu0  ;;  %v1787_v54 = vpop.f32.mrf.mxu1 }
  0xd3   :  { %v738_v20 = vsel %vm737_vm2, %v673_v16, 0.0  ;;  %v365_v21 = vadd.f32 %v1760_v8, %v364_v18  ;;  %v676_v24 = vmax.f32 %v370_v17, 0.0 }
  0xd4   :  { %v740_v22 = vadd.f32 %v739_v19, %v738_v20  ;;  %v1317_v23 = vpop.f32.mrf.mxu0  ;;  %v1799_v2 = vpop.f32.mrf.mxu1 }
  0xd5   :  { %v675_v25 = vmax.f32 %v365_v21, 0.0  ;;  %v380_v26 = vadd.f32 %v1317_v23, %v1760_v8  ;;  %v743_v33 = vsel %vm737_vm2, %v676_v24, 0.0 }
  0xd6   :  { %v374_v27 = vpop.f32.mrf.mxu0  ;;  %v1805_v15 = vpop.f32.mrf.mxu1 }
  0xd7   :  { %v741_v28 = vsel %vm737_vm2, %v675_v25, 0.0  ;;  %v375_v29 = vadd.f32 %v1760_v8, %v374_v27  ;;  %v678_v34 = vmax.f32 %v380_v26, 0.0 }
  0xd8   :  { %v742_v30 = vadd.f32 %v741_v28, %v740_v22  ;;  %v1320_v31 = vpop.f32.mrf.mxu0  ;;  %v1811_v26 = vpop.f32.mrf.mxu1 }
  0xd9   :  { %v677_v35 = vmax.f32 %v375_v29, 0.0  ;;  %v390_v36 = vadd.f32 %v1320_v31, %v1760_v8  ;;  %v747_v44 = vsel %vm737_vm2, %v678_v34, 0.0 }
  0xda   :  { %v744_v37 = vadd.f32 %v743_v33, %v742_v30  ;;  %v384_v38 = vpop.f32.mrf.mxu0 }
  0xdb   :  { %v745_v39 = vsel %vm737_vm2, %v677_v35, 0.0  ;;  %v385_v40 = vadd.f32 %v1760_v8, %v384_v38  ;;  %v680_v45 = vmax.f32 %v390_v36, 0.0  ;;  %v1817_v38 = vpop.f32.mrf.mxu1 }
  0xdc   :  { %v746_v41 = vadd.f32 %v745_v39, %v744_v37  ;;  %v1323_v42 = vpop.f32.mrf.mxu0 }
  0xdd   :  { %v679_v46 = vmax.f32 %v385_v40, 0.0  ;;  %v400_v47 = vadd.f32 %v1323_v42, %v1760_v8  ;;  %v751_v56 = vsel %vm737_vm2, %v680_v45, 0.0 }
  0xde   :  { %v748_v48 = vadd.f32 %v747_v44, %v746_v41  ;;  %v394_v49 = vpop.f32.mrf.mxu0 }
  0xdf   :  { %v749_v50 = vsel %vm737_vm2, %v679_v46, 0.0  ;;  %v395_v51 = vadd.f32 %v1760_v8, %v394_v49  ;;  %v682_v57 = vmax.f32 %v400_v47, 0.0 }
  0xe0   :  { %v750_v52 = vadd.f32 %v749_v50, %v748_v48  ;;  %v1326_v53 = vpop.f32.mrf.mxu0  ;;  %v1823_v50 = vpop.f32.mrf.mxu1 }
  0xe1   :  { %v681_v58 = vmax.f32 %v395_v51, 0.0  ;;  %v410_v59 = vadd.f32 %v1326_v53, %v1760_v8  ;;  %v755_v3 = vsel %vm737_vm2, %v682_v57, 0.0 }
  0xe2   :  { %v752_v60 = vadd.f32 %v751_v56, %v750_v52  ;;  %v404_v61 = vpop.f32.mrf.mxu0 }
  0xe3   :  { %v753_v62 = vsel %vm737_vm2, %v681_v58, 0.0  ;;  %v405_v63 = vadd.f32 %v1760_v8, %v404_v61  ;;  %v684_v4 = vmax.f32 %v410_v59, 0.0 }
  0xe4   :  { %v754_v0 = vadd.f32 %v753_v62, %v752_v60  ;;  %v1329_v1 = vpop.f32.mrf.mxu0  ;;  %v1829_v62 = vpop.f32.mrf.mxu1 }
  0xe5   :  { %v683_v6 = vmax.f32 %v405_v63, 0.0  ;;  %v420_v7 = vadd.f32 %v1329_v1, %v1760_v8  ;;  %v759_v16 = vsel %vm737_vm2, %v684_v4, 0.0 }
  0xe6   :  { %v756_v9 = vadd.f32 %v755_v3, %v754_v0  ;;  %v414_v10 = vpop.f32.mrf.mxu0 }
  0xe7   :  { %v757_v11 = vsel %vm737_vm2, %v683_v6, 0.0  ;;  %v415_v12 = vadd.f32 %v1760_v8, %v414_v10  ;;  %v686_v17 = vmax.f32 %v420_v7, 0.0 }
  0xe8   :  { %v758_v13 = vadd.f32 %v757_v11, %v756_v9  ;;  %v1332_v14 = vpop.f32.mrf.mxu0 }
  0xe9   :  { %v685_v18 = vmax.f32 %v415_v12, 0.0  ;;  %v430_v19 = vadd.f32 %v1332_v14, %v1760_v8  ;;  %v763_v27 = vsel %vm737_vm2, %v686_v17, 0.0  ;;  %v1835_v12 = vpop.f32.mrf.mxu1 }
  0xea   :  { %v760_v20 = vadd.f32 %v759_v16, %v758_v13  ;;  %v424_v21 = vpop.f32.mrf.mxu0 }
  0xeb   :  { %v761_v22 = vsel %vm737_vm2, %v685_v18, 0.0  ;;  %v425_v23 = vadd.f32 %v1760_v8, %v424_v21  ;;  %v688_v28 = vmax.f32 %v430_v19, 0.0 }
  0xec   :  { %v762_v24 = vadd.f32 %v761_v22, %v760_v20  ;;  %v1335_v25 = vpop.f32.mrf.mxu0 }
  0xed   :  { %v687_v29 = vmax.f32 %v425_v23, 0.0  ;;  %v440_v30 = vadd.f32 %v1335_v25, %v1760_v8  ;;  %v767_v39 = vsel %vm737_vm2, %v688_v28, 0.0 }
  0xee   :  { %v764_v31 = vadd.f32 %v763_v27, %v762_v24  ;;  %v434_v33 = vpop.f32.mrf.mxu0  ;;  %v1841_v24 = vpop.f32.mrf.mxu1 }
  0xef   :  { %v765_v34 = vsel %vm737_vm2, %v687_v29, 0.0  ;;  %v435_v35 = vadd.f32 %v1760_v8, %v434_v33  ;;  %v690_v40 = vmax.f32 %v440_v30, 0.0 }
  0xf0   :  { %v766_v36 = vadd.f32 %v765_v34, %v764_v31  ;;  %v1338_v37 = vpop.f32.mrf.mxu0 }
  0xf1   :  { %v689_v41 = vmax.f32 %v435_v35, 0.0  ;;  %v450_v42 = vadd.f32 %v1338_v37, %v1760_v8  ;;  %v771_v51 = vsel %vm737_vm2, %v690_v40, 0.0  ;;  %v1847_v37 = vpop.f32.mrf.mxu1 }
  0xf2   :  { %v768_v44 = vadd.f32 %v767_v39, %v766_v36  ;;  %v444_v45 = vpop.f32.mrf.mxu0 }
  0xf3   :  { %v769_v46 = vsel %vm737_vm2, %v689_v41, 0.0  ;;  %v445_v47 = vadd.f32 %v1760_v8, %v444_v45  ;;  %v692_v52 = vmax.f32 %v450_v42, 0.0 }
  0xf4   :  { %v770_v48 = vadd.f32 %v769_v46, %v768_v44  ;;  %v1341_v49 = vpop.f32.mrf.mxu0 }
  0xf5   :  { %v691_v53 = vmax.f32 %v445_v47, 0.0  ;;  %v460_v55 = vadd.f32 %v1341_v49, %v1760_v8  ;;  %v775_v63 = vsel %vm737_vm2, %v692_v52, 0.0 }
  0xf6   :  { %v772_v56 = vadd.f32 %v771_v51, %v770_v48  ;;  %v454_v57 = vpop.f32.mrf.mxu0  ;;  %v1853_v51 = vpop.f32.mrf.mxu1 }
  0xf7   :  { %v773_v58 = vsel %vm737_vm2, %v691_v53, 0.0  ;;  %v455_v59 = vadd.f32 %v1760_v8, %v454_v57  ;;  %v694_v0 = vmax.f32 %v460_v55, 0.0 }
  0xf8   :  { %v774_v60 = vadd.f32 %v773_v58, %v772_v56  ;;  %v1344_v61 = vpop.f32.mrf.mxu0 }
  0xf9   :  { %v693_v1 = vmax.f32 %v455_v59, 0.0  ;;  %v470_v3 = vadd.f32 %v1344_v61, %v1760_v8  ;;  %v779_v13 = vsel %vm737_vm2, %v694_v0, 0.0  ;;  %v1859_v0 = vpop.f32.mrf.mxu1 }
  0xfa   :  { %v776_v4 = vadd.f32 %v775_v63, %v774_v60  ;;  %v464_v6 = vpop.f32.mrf.mxu0 }
  0xfb   :  { %v777_v7 = vsel %vm737_vm2, %v693_v1, 0.0  ;;  %v465_v9 = vadd.f32 %v1760_v8, %v464_v6  ;;  %v696_v14 = vmax.f32 %v470_v3, 0.0 }
  0xfc   :  { %v778_v10 = vadd.f32 %v777_v7, %v776_v4  ;;  %v1347_v11 = vpop.f32.mrf.mxu0 }
  0xfd   :  { %v695_v16 = vmax.f32 %v465_v9, 0.0  ;;  %v480_v17 = vadd.f32 %v1347_v11, %v1760_v8  ;;  %v783_v25 = vsel %vm737_vm2, %v696_v14, 0.0 }
  0xfe   :  { %v780_v18 = vadd.f32 %v779_v13, %v778_v10  ;;  %v474_v19 = vpop.f32.mrf.mxu0 }
  0xff   :  { %v781_v20 = vsel %vm737_vm2, %v695_v16, 0.0  ;;  %v475_v21 = vadd.f32 %v1760_v8, %v474_v19  ;;  %v698_v27 = vmax.f32 %v480_v17, 0.0  ;;  %v1865_v16 = vpop.f32.mrf.mxu1 }
 0x100   :  { %v782_v22 = vadd.f32 %v781_v20, %v780_v18  ;;  %v1350_v23 = vpop.f32.mrf.mxu0 }
 0x101   :  { %v697_v28 = vmax.f32 %v475_v21, 0.0  ;;  %v490_v29 = vadd.f32 %v1350_v23, %v1760_v8  ;;  %v787_v39 = vsel %vm737_vm2, %v698_v27, 0.0  ;;  %v535_v27 = vadd.f32 %v1760_v8, %v1781_v43 }
 0x102   :  { %v784_v30 = vadd.f32 %v783_v25, %v782_v22  ;;  %v484_v31 = vpop.f32.mrf.mxu0 }
 0x103   :  { %v785_v33 = vsel %vm737_vm2, %v697_v28, 0.0  ;;  %v485_v34 = vadd.f32 %v1760_v8, %v484_v31  ;;  %v700_v40 = vmax.f32 %v490_v29, 0.0  ;;  %v604_v28 = vpop.f32.mrf.mxu1 }
 0x104   :  { %v786_v35 = vadd.f32 %v785_v33, %v784_v30  ;;  %v1353_v36 = vpop.f32.mrf.mxu0  ;;  %v540_v33 = vadd.f32 %v1775_v32, %v1760_v8 }
 0x105   :  { %v699_v41 = vmax.f32 %v485_v34, 0.0  ;;  %v500_v42 = vadd.f32 %v1353_v36, %v1760_v8  ;;  %v791_v52 = vsel %vm737_vm2, %v700_v40, 0.0  ;;  %v709_v36 = vmax.f32 %v535_v27, 0.0 }
 0x106   :  { %v788_v44 = vadd.f32 %v787_v39, %v786_v35  ;;  %v494_v45 = vpop.f32.mrf.mxu0  ;;  %v545_v39 = vadd.f32 %v1760_v8, %v1799_v2 }
 0x107   :  { %v789_v46 = vsel %vm737_vm2, %v699_v41, 0.0  ;;  %v495_v47 = vadd.f32 %v1760_v8, %v494_v45  ;;  %v702_v53 = vmax.f32 %v500_v42, 0.0  ;;  %v1881_v41 = vpop.f32.mrf.mxu1  ;;  %v710_v42 = vmax.f32 %v540_v33, 0.0 }
 0x108   :  { %v790_v48 = vadd.f32 %v789_v46, %v788_v44  ;;  %v1356_v49 = vpop.f32.mrf.mxu0  ;;  %v550_v44 = vadd.f32 %v1787_v54, %v1760_v8  ;;  %v814_v46 = vsel %vm737_vm2, %v709_v36, 0.0  ;;  %v711_v32 = vmax.f32 %v545_v39, 0.0 }
 0x109   :  { %v701_v55 = vmax.f32 %v495_v47, 0.0  ;;  %v510_v56 = vadd.f32 %v1356_v49, %v1760_v8  ;;  %v795_v1 = vsel %vm737_vm2, %v702_v53, 0.0  ;;  %v555_v47 = vadd.f32 %v1760_v8, %v1811_v26  ;;  %v614_v49 = vpop.f32.mrf.mxu1 }
 0x10a   :  { %v792_v57 = vadd.f32 %v791_v52, %v790_v48  ;;  %v504_v58 = vpop.f32.mrf.mxu0  ;;  %v816_v2 = vsel %vm737_vm2, %v710_v42, 0.0  ;;  %v712_v52 = vmax.f32 %v550_v44, 0.0  ;;  %v560_v53 = vadd.f32 %v1805_v15, %v1760_v8 }
 0x10b   :  { %v793_v59 = vsel %vm737_vm2, %v701_v55, 0.0  ;;  %v505_v60 = vadd.f32 %v1760_v8, %v504_v58  ;;  %v704_v3 = vmax.f32 %v510_v56, 0.0  ;;  %v818_v56 = vsel %vm737_vm2, %v711_v32, 0.0 }
 0x10c   :  { %v794_v61 = vadd.f32 %v793_v59, %v792_v57  ;;  %v1359_v63 = vpop.f32.mrf.mxu0  ;;  %v713_v57 = vmax.f32 %v555_v47, 0.0  ;;  %v565_v54 = vadd.f32 %v1760_v8, %v1823_v50  ;;  %v1392_v59 = vpop.f32.mrf.mxu1  ;;  %v714_v26 = vmax.f32 %v560_v53, 0.0 }
 0x10d   :  { %v703_v4 = vmax.f32 %v505_v60, 0.0  ;;  %v520_v6 = vadd.f32 %v1359_v63, %v1760_v8  ;;  %v799_v17 = vsel %vm737_vm2, %v704_v3, 0.0  ;;  %v820_v60 = vsel %vm737_vm2, %v712_v52, 0.0 }
 0x10e   :  { %v796_v7 = vadd.f32 %v795_v1, %v794_v61  ;;  %v514_v9 = vpop.f32.mrf.mxu0  ;;  %v570_v61 = vadd.f32 %v1817_v38, %v1760_v8  ;;  %v822_v1 = vsel %vm737_vm2, %v713_v57, 0.0  ;;  %v715_v3 = vmax.f32 %v565_v54, 0.0 }
 0x10f   :  { %v797_v10 = vsel %vm737_vm2, %v703_v4, 0.0  ;;  %v515_v11 = vadd.f32 %v1760_v8, %v514_v9  ;;  %v706_v18 = vmax.f32 %v520_v6, 0.0  ;;  %v575_v15 = vadd.f32 %v1760_v8, %v1835_v12  ;;  %v624_v6 = vpop.f32.mrf.mxu1 }
 0x110   :  { %v798_v13 = vadd.f32 %v797_v10, %v796_v7  ;;  %v1362_v14 = vpop.f32.mrf.mxu0  ;;  %v824_v7 = vsel %vm737_vm2, %v714_v26, 0.0  ;;  %v716_v50 = vmax.f32 %v570_v61, 0.0  ;;  %v580_v9 = vadd.f32 %v1829_v62, %v1760_v8 }
 0x111   :  { %v705_v19 = vmax.f32 %v515_v11, 0.0  ;;  %v530_v20 = vadd.f32 %v1362_v14, %v1760_v8  ;;  %v808_v29 = vsel %vm737_vm2, %v706_v18, 0.0  ;;  %v826_v11 = vsel %vm737_vm2, %v715_v3, 0.0 }
 0x112   :  { %v1869_v21 = vadd.f32 %v799_v17, %v798_v13  ;;  %v524_v22 = vpop.f32.mrf.mxu0  ;;  %v717_v13 = vmax.f32 %v575_v15, 0.0  ;;  %v585_v38 = vadd.f32 %v1760_v8, %v1847_v37  ;;  %v1395_v17 = vpop.f32.mrf.mxu1  ;;  %v828_v18 = vsel %vm737_vm2, %v716_v50, 0.0 }
 0x113   :  { %v807_v23 = vsel %vm737_vm2, %v705_v19, 0.0  ;;  %v525_v25 = vadd.f32 %v1760_v8, %v524_v22  ;;  %v708_v30 = vmax.f32 %v530_v20, 0.0  ;;  %v718_v12 = vmax.f32 %v580_v9, 0.0 }
 0x114   :  { %v809_v34 = vadd.f32 %v808_v29, %v807_v23  ;;  %v590_v19 = vadd.f32 %v1841_v24, %v1760_v8  ;;  %v830_v22 = vsel %vm737_vm2, %v717_v13, 0.0  ;;  %v719_v23 = vmax.f32 %v585_v38, 0.0  ;;  %v634_v27 = vpop.f32.mrf.mxu1 }
 0x115   :  { %v707_v31 = vmax.f32 %v525_v25, 0.0  ;;  %v812_v43 = vsel %vm737_vm2, %v708_v30, 0.0  ;;  %v595_v62 = vadd.f32 %v1760_v8, %v1859_v0  ;;  %v832_v29 = vsel %vm737_vm2, %v718_v12, 0.0 }
 0x116   :  { %v720_v37 = vmax.f32 %v590_v19, 0.0  ;;  %v600_v30 = vadd.f32 %v1853_v51, %v1760_v8  ;;  %v834_v33 = vsel %vm737_vm2, %v719_v23, 0.0  ;;  %v605_v24 = vadd.f32 %v1760_v8, %v604_v28  ;;  %v1398_v36 = vpop.f32.mrf.mxu1 }
 0x117   :  { %v810_v35 = vsel %vm737_vm2, %v707_v31, 0.0  ;;  %v610_v0 = vadd.f32 %v1865_v16, %v1760_v8  ;;  %v615_v51 = vadd.f32 %v1760_v8, %v614_v49  ;;  %v620_v28 = vadd.f32 %v1881_v41, %v1760_v8 }
 0x118   :  { %v811_v40 = vadd.f32 %v810_v35, %v809_v34  ;;  %v721_v34 = vmax.f32 %v595_v62, 0.0  ;;  %v836_v39 = vsel %vm737_vm2, %v720_v37, 0.0  ;;  %v723_v44 = vmax.f32 %v605_v24, 0.0 }
 0x119   :  { %v724_v47 = vmax.f32 %v610_v0, 0.0  ;;  %v725_v52 = vmax.f32 %v615_v51, 0.0  ;;  %v625_v16 = vadd.f32 %v1760_v8, %v624_v6  ;;  %v726_v57 = vmax.f32 %v620_v28, 0.0 }
 0x11a   :  { %v813_v45 = vadd.f32 %v812_v43, %v811_v40  ;;  %v722_v40 = vmax.f32 %v600_v30, 0.0  ;;  %v838_v42 = vsel %vm737_vm2, %v721_v34, 0.0  ;;  %v630_v49 = vadd.f32 %v1392_v59, %v1760_v8 }
 0x11b   :  { %v635_v26 = vadd.f32 %v1760_v8, %v634_v27  ;;  %v640_v3 = vadd.f32 %v1395_v17, %v1760_v8 }
 0x11c   :  { %v815_v48 = vadd.f32 %v814_v46, %v813_v45  ;;  %v644_v46 = vpop.f32.mrf.mxu1  ;;  %v840_v32 = vsel %vm737_vm2, %v722_v40, 0.0 }
 0x11d   :  { %v729_v6 = vmax.f32 %v635_v26, 0.0 }
 0x11e   :  { %v817_v55 = vadd.f32 %v816_v2, %v815_v48  ;;  %v842_v2 = vsel %vm737_vm2, %v723_v44, 0.0 }
 0x11f   :  { %v854_v38 = vsel %vm737_vm2, %v729_v6, 0.0 }
 0x120   :  { %v819_v58 = vadd.f32 %v818_v56, %v817_v55  ;;  %v1401_v55 = vpop.f32.mrf.mxu1  ;;  %v844_v56 = vsel %vm737_vm2, %v724_v47, 0.0 }
 0x122   :  { %v821_v63 = vadd.f32 %v820_v60, %v819_v58  ;;  %v846_v58 = vsel %vm737_vm2, %v725_v52, 0.0  ;;  %v727_v60 = vmax.f32 %v625_v16, 0.0  ;;  %v654_v61 = vpop.f32.mrf.mxu1 }
 0x124   :  { %v823_v4 = vadd.f32 %v822_v1, %v821_v63  ;;  %v848_v63 = vsel %vm737_vm2, %v726_v57, 0.0  ;;  %v728_v1 = vmax.f32 %v630_v49, 0.0  ;;  %v1404_v50 = vpop.f32.mrf.mxu1  ;;  %v883_v57 = vld [vmem:[%s1996_s2 + $0x28] sm:$0xff]  ;;  %v882_v49 = vld [vmem:[%s1996_s2 + $0x20] sm:$0xff] }
 0x126   :  { %v825_v10 = vadd.f32 %v824_v7, %v823_v4  ;;  %v850_v4 = vsel %vm737_vm2, %v727_v60, 0.0  ;;  %v645_v7 = vadd.f32 %v1760_v8, %v644_v46  ;;  %v852_v9 = vsel %vm737_vm2, %v728_v1, 0.0  ;;  %v664_v12 = vpop.f32.mrf.mxu1  ;;  %v885_v1 = vld [vmem:[%s1996_s2 + $0x38] sm:$0xff] }
 0x127   :  { %v665_v27 = vadd.f32 %v1760_v8, %v664_v12 }
 0x128   :  { %v827_v14 = vadd.f32 %v826_v11, %v825_v10  ;;  %v730_v10 = vmax.f32 %v640_v3, 0.0  ;;  %v650_v11 = vadd.f32 %v1398_v36, %v1760_v8  ;;  %v884_v3 = vld [vmem:[%s1996_s2 + $0x30] sm:$0xff] }
 0x12a   :  { %v829_v20 = vadd.f32 %v828_v18, %v827_v14  ;;  %v731_v14 = vmax.f32 %v645_v7, 0.0  ;;  %v655_v18 = vadd.f32 %v1760_v8, %v654_v61  ;;  %v856_v19 = vsel %vm737_vm2, %v730_v10, 0.0  ;;  %v887_v61 = vld [vmem:[%s1996_s2 + $0x48] sm:$0xff] }
 0x12c   :  { %v831_v25 = vadd.f32 %v830_v22, %v829_v20  ;;  %v732_v20 = vmax.f32 %v650_v11, 0.0  ;;  %v660_v22 = vadd.f32 %v1401_v55, %v1760_v8  ;;  %v858_v62 = vsel %vm737_vm2, %v731_v14, 0.0 }
 0x12e   :  { %v833_v31 = vadd.f32 %v832_v29, %v831_v25  ;;  %v733_v25 = vmax.f32 %v655_v18, 0.0  ;;  %v801_v29 = vrot.slane %v1869_v21, 4  ;;  %v860_v30 = vsel %vm737_vm2, %v732_v20, 0.0 }
 0x130   :  { %v835_v35 = vadd.f32 %v834_v33, %v833_v31  ;;  %v734_v31 = vmax.f32 %v660_v22, 0.0  ;;  %v670_v33 = vadd.f32 %v1404_v50, %v1760_v8  ;;  %v862_v24 = vsel %vm737_vm2, %v733_v25, 0.0 }
 0x131   :  { %v802_v36 = vadd.f32 %v801_v29, %v1869_v21 }
 0x132   :  { %v837_v43 = vadd.f32 %v836_v39, %v835_v35  ;;  %v735_v35 = vmax.f32 %v665_v27, 0.0  ;;  %v864_v40 = vsel %vm737_vm2, %v734_v31, 0.0  ;;  %v736_v0 = vmax.f32 %v670_v33, 0.0 }
 0x133   :  { %v803_v44 = vrot.slane %v802_v36, 2 }
 0x134   :  { %v839_v45 = vadd.f32 %v838_v42, %v837_v43  ;;  %v866_v42 = vsel %vm737_vm2, %v735_v35, 0.0 }
 0x136   :  { %v841_v48 = vadd.f32 %v840_v32, %v839_v45  ;;  %v868_v45 = vsel %vm737_vm2, %v736_v0, 0.0  ;;  %v804_v32 = vadd.f32 %v803_v44, %v802_v36 }
 0x138   :  { %v843_v53 = vadd.f32 %v842_v2, %v841_v48  ;;  %v805_v28 = vrot.slane %v804_v32, 1 }
 0x13a   :  { %v845_v54 = vadd.f32 %v844_v56, %v843_v53  ;;  %v806_v52 = vadd.f32 %v805_v28, %v804_v32 }
 0x13c   :  { %v847_v41 = vadd.f32 %v846_v58, %v845_v54  ;;  %v876_v53 = vmul.f32 0.00390625, %v806_v52  ;;  %v1211_v54 = vld [vmem:[%s1997_s3 + $0x1] ss:$0 sm:$0xff] }
 0x13e   :  { %v849_v15 = vadd.f32 %v848_v63, %v847_v41  ;;  %v886_v63 = vld [vmem:[%s1996_s2 + $0x40] sm:$0xff]  ;;  %s1451_s2 = smov 64  }
 0x140   :  { %v851_v59 = vadd.f32 %v850_v4, %v849_v15  ;;  %v1213_v15 = vld [vmem:[%s1997_s3 + $0x2] ss:$0 sm:$0xff] }
 0x142   :  { %v853_v13 = vadd.f32 %v852_v9, %v851_v59 }
 0x144   :  { %v855_v17 = vadd.f32 %v854_v38, %v853_v13 }
 0x146   :  { %v857_v23 = vadd.f32 %v856_v19, %v855_v17 }
 0x148   :  { %v859_v37 = vadd.f32 %v858_v62, %v857_v23 }
 0x14a   :  { %v861_v34 = vadd.f32 %v860_v30, %v859_v37 }
 0x14c   :  { %v863_v39 = vadd.f32 %v862_v24, %v861_v34 }
 0x14e   :  { %v865_v43 = vadd.f32 %v864_v40, %v863_v39 }
 0x150   :  { %v867_v51 = vadd.f32 %v866_v42, %v865_v43 }
 0x152   :  { %v869_v46 = vadd.f32 %v868_v45, %v867_v51 }
 0x154   :  { %v870_v8 = vrot.slane %v869_v46, 4 }
 0x156   :  { %v871_v47 = vadd.f32 %v870_v8, %v869_v46 }
 0x158   :  { %v872_v48 = vrot.slane %v871_v47, 2 }
 0x15a   :  { %v873_v2 = vadd.f32 %v872_v48, %v871_v47 }
 0x15c   :  { %v874_v21 = vrot.slane %v873_v2, 1 }
 0x15e   :  { %v875_v16 = vadd.f32 %v874_v21, %v873_v2 }
 0x160   :  { %v877_v55 = vmul.f32 0.00390625, %v875_v16 }
 0x162   :  { %v898_v56 = vsel %vm897_vm4, %v877_v55, %v876_v53 }
 0x163   :  { %1414 = vmatmul.mubr.msk.f32.vlgmr.msra.gmra.mxu1 %vm737_vm2, %v898_v56 }
 0x164   :  { %1420 = vmatprep.mubr.msk.f32.mxu1 %vm1449_vm3, %v1448_v5  ;;  %1417 = vmatpush3.msra.mxu1 %v883_v57 }
 0x165   :  { %1418 = vmatprep.subr.mxu1 %v1448_v5 }
 0x166   :  { %1419 = vmatpush3.msra.mxu1 %v882_v49 }
 0x167   :  { %1423 = vmatprep.subr.mxu1 %v1448_v5 }
 0x223   :  { %v967_v58 = vpop.f32.mrf.mxu1 }
 0x224   :  { %v968_v60 = vadd.f32 %v1211_v54, %v967_v58 }
 0x225   :  { %v1415_v26 = vpop.f32.mrf.mxu1 }
 0x226   :  { %v971_v41 = vmax.f32 %v968_v60, 0.0 }
 0x228   :  { %1421 = vmatmul.mubr.msk.f32.vlgmr.msra.gmra.mxu1 %vm976_vm5, %v971_v41 }
 0x229   :  { %1424 = vmatpush3.msra.mxu1 %v887_v61  ;;  %1431 = vmatprep.mubr.msk.f32.mxu1 %vm1449_vm3, %v1448_v5 }
 0x22a   :  { %1425 = vmatprep.subr.mxu1 %v1448_v5 }
 0x22b   :  { %1426 = vmatpush3.msra.mxu1 %v886_v63 }
 0x22c   :  { %1427 = vmatprep.subr.mxu1 %v1448_v5 }
 0x22d   :  { %1428 = vmatpush3.msra.mxu1 %v885_v1 }
 0x22e   :  { %1429 = vmatprep.subr.mxu1 %v1448_v5  ;;  %v1215_v5 = vld [vmem:[%s1997_s3 + $0x3] ss:$0 sm:$0xff] }
 0x22f   :  { %1430 = vmatpush3.msra.mxu1 %v884_v3 }
 0x2e8   :  { %v1046_v4 = vpop.f32.mrf.mxu1 }
 0x2e9   :  { %v1047_v6 = vadd.f32 %v1213_v15, %v1046_v4 }
 0x2ea   :  { %v1422_v7 = vpop.f32.mrf.mxu1 }
 0x2eb   :  { %1128 = vrot.lane.b32.xlu0 %v1047_v6, %s1450_s16  ;;  %1432 = vmatmul.mubr.msk.f32.vlgmr.msra.gmra.mxu1 %vm737_vm2, %v1047_v6 }
 0x35d   :  { %v1129_v10 = vpop.permute.xlu0 %1128 }
 0x35e   :  { %v1135_v11 = vsel %vm737_vm2, %v898_v56, %v1129_v10 }
 0x3ab   :  { %v1123_v59 = vpop.f32.mrf.mxu1 }
 0x3ac   :  { %v1124_v50 = vadd.f32 %v1215_v5, %v1123_v59 }
 0x3ad   :  { %v1433_v9 = vpop.f32.mrf.mxu1 }
 0x3ae   :  { %1132 = vrot.lane.b32.xlu0 %v1124_v50, %s1451_s2 }
 0x420   :  { %v1133_v13 = vpop.permute.xlu0 %1132 }
 0x421   :  { %v1137_v38 = vsel %vm1136_vm6, %v1135_v11, %v1133_v13 }
 0x422   :  { %v1139_v14 = vsel %vm1138_vm7, %v1137_v38, 0.0 }
 0x423   :  { %1140 = vst [vmem:[%s1998_s4] sm:$0x3] %v1139_v14 }

</bundles_post_ra>
